<compile_context>
chip_gen: v5e
topology: v5e:2x2
jax: 0.10.0
libtpu: 0.0.40
codegen_flags: <defaults>
</compile_context>

<pallas_src>
import functools

import jax
import jax.numpy as jnp
from jax import lax
from jax.experimental import pallas as pl
from jax.experimental.pallas import tpu as pltpu

EPSILON = 1e-5

_LANE = 128
_SUBLANE = 8
# Double-buffered input blocks must fit here; conservative for v7x (64 MiB VMEM).
_TILE_VMEM_BUDGET = 24 * 1024 * 1024
_VMEM_LIMIT = 48 * 1024 * 1024


def _largest_tile(dim, cap, quantum):
    """Largest divisor of `dim` that is a multiple of `quantum` and <= cap.

    Returns `dim` itself if dim <= cap; returns None if no such divisor exists
    (callers fall back to the full, un-blocked dimension).
    """
    if dim <= cap:
        return dim
    best = None
    for cand in range(quantum, cap + 1, quantum):
        if dim % cand == 0:
            best = cand
    return best


def _dice_kernel(pred_ref, tgt_ref, out_ref, inter_ref, denom_ref, *, eps):
    """One (rows, voxel-chunk, channel) grid step.

    pred_ref : (nt_b, v_b) logits slice for this channel's voxel chunk.
    tgt_ref  : (nt_b, v_b) integer labels for the same voxel chunk.
    out_ref  : (nt_b, C)   per-row (1 - dice), written on the last (j, ch) step.
    inter_ref, denom_ref : (nt_b, C) f32 accumulators (VMEM scratch).
    """
    j = pl.program_id(1)            # voxel-chunk index (reduction axis)
    ch = pl.program_id(2)           # channel index (fastest axis)
    n_v = pl.num_programs(1)
    n_ch = pl.num_programs(2)

    @pl.when(jnp.logical_and(j == 0, ch == 0))
    def _():
        inter_ref[...] = jnp.zeros_like(inter_ref)
        denom_ref[...] = jnp.zeros_like(denom_ref)

    pred = pred_ref[...].astype(jnp.float32)        # (nt_b, v_b)
    tgt = tgt_ref[...].astype(jnp.int32)            # (nt_b, v_b)
    mask = tgt == ch                                # in-kernel "one-hot"

    # inter = sum(pred * onehot); denom = sum(pred) + sum(onehot)
    inter = jnp.sum(jnp.where(mask, pred, 0.0), axis=-1, keepdims=True)   # (nt_b, 1)
    denom = (jnp.sum(pred, axis=-1, keepdims=True)
             + jnp.sum(mask.astype(jnp.float32), axis=-1, keepdims=True))  # (nt_b, 1)

    # Scatter this channel's partial sums into lane `ch` of the accumulators.
    col = lax.broadcasted_iota(jnp.int32, inter_ref.shape, 1)             # (nt_b, C)
    sel = col == ch
    inter_ref[...] += jnp.where(sel, inter, 0.0)
    denom_ref[...] += jnp.where(sel, denom, 0.0)

    @pl.when(jnp.logical_and(j == n_v - 1, ch == n_ch - 1))
    def _():
        dice = 2.0 * inter_ref[...] / (denom_ref[...] + eps)
        out_ref[...] = 1.0 - dice


def dice_loss_lstm(logits, targets, labels, *, epsilon=EPSILON):
    """logits: (N, T, C, Z, Y, X) float (f32 or bf16); targets: (N, T, Z, Y, X) int."""
    n, t, nch, z, y, x = logits.shape
    assert nch == len(labels), "channel dim must equal len(labels)"
    assert targets.shape == (n, t, z, y, x)

    nt = n * t
    v = z * y * x

    # Free reshapes: rows are (n, t); logits keep channel-major voxel layout.
    pred2d = logits.reshape(nt, nch * v)            # keep source dtype (f32/bf16)
    tgt2d = targets.reshape(nt, v)

    # ---- tile selection under the VMEM budget (double-buffered inputs) ----
    pred_bytes = jnp.dtype(logits.dtype).itemsize
    per_elem = pred_bytes + 4                       # budget targets as int32 (worst case)

    cap_v = max(_LANE, _TILE_VMEM_BUDGET // (2 * _SUBLANE * per_elem))
    v_b = _largest_tile(v, cap_v, _LANE) or v       # fallback: full voxel axis
    n_v = v // v_b

    cap_nt = max(_SUBLANE, _TILE_VMEM_BUDGET // (2 * v_b * per_elem))
    nt_b = _largest_tile(nt, cap_nt, _SUBLANE) or nt
    n_nt = nt // nt_b

    # int8 targets (fewest HBM bytes) when the row tile is compatible with the
    # packed (32, 128) sublane tiling; otherwise fall back to int32.
    int8_ok = (nt_b == nt or nt_b % 32 == 0) and nch <= 127
    if tgt2d.dtype in (jnp.int8, jnp.uint8):
        tgt2d = tgt2d if int8_ok else tgt2d.astype(jnp.int32)
    elif tgt2d.dtype not in (jnp.int32, jnp.uint32):
        tgt2d = tgt2d.astype(jnp.int32)

    grid = (n_nt, n_v, nch)
    kernel = functools.partial(_dice_kernel, eps=float(epsilon))

    per_row = pl.pallas_call(
        kernel,
        out_shape=jax.ShapeDtypeStruct((nt, nch), jnp.float32),
        grid_spec=pltpu.PrefetchScalarGridSpec(
            num_scalar_prefetch=0,
            grid=grid,
            in_specs=[
                # logits (NT, C*V): channel ch's j-th voxel chunk.
                pl.BlockSpec((nt_b, v_b),
                             lambda i, j, ch, _nv=n_v: (i, ch * _nv + j)),
                # targets (NT, V): same voxel chunk, shared across channels
                # (block index constant over ch -> DMA elided on the ch sweep).
                pl.BlockSpec((nt_b, v_b), lambda i, j, ch: (i, j)),
            ],
            out_specs=pl.BlockSpec((nt_b, nch), lambda i, j, ch: (i, 0)),
            scratch_shapes=[
                pltpu.VMEM((nt_b, nch), jnp.float32),   # intersection accumulator
                pltpu.VMEM((nt_b, nch), jnp.float32),   # denominator accumulator
            ],
        ),
        compiler_params=pltpu.CompilerParams(
            dimension_semantics=("parallel", "arbitrary", "arbitrary"),
            vmem_limit_bytes=_VMEM_LIMIT,
        ),
    )(pred2d, tgt2d)

    # Uniform 1/(N*T*C) weights -> plain mean of all per-row (1 - dice) terms.
    return jnp.mean(per_row)


def _reference(logits, targets, labels, epsilon=EPSILON):
    """Pure-JAX replica of the PyTorch nested-loop forward (for checking)."""
    n, t, nch, z, y, x = logits.shape
    onehot = (targets[:, :, None].astype(jnp.int32) ==
              jnp.arange(nch, dtype=jnp.int32)[None, None, :, None, None, None]
              ).astype(jnp.float32)
    tot = 0.0
    for tp in range(t):
        ts_loss = 0.0
        for i in range(nch):
            pred = logits[:, tp, i].astype(jnp.float32).reshape(n, -1)
            seg = onehot[:, tp, i].reshape(n, -1)
            inter = (pred * seg).sum(-1)
            dice = 2.0 * inter / ((pred + seg).sum(-1) + epsilon)
            ts_loss += jnp.mean(1.0 - dice)
        tot += ts_loss / nch
    return tot / t


if __name__ == "__main__":
    # Small shapes consistent with the module: (N, T, C, Z, Y, X)
    labels = [0, 1, 2]
    N, T, C, Z, Y, X = 2, 4, len(labels), 4, 8, 16

    key = jax.random.PRNGKey(0)
    k1, k2 = jax.random.split(key)
    logits = jax.random.normal(k1, (N, T, C, Z, Y, X), dtype=jnp.float32)
    targets = jax.random.randint(k2, (N, T, Z, Y, X), 0, C,
                                 dtype=jnp.int32).astype(jnp.int8)

    loss = jax.block_until_ready(dice_loss_lstm(logits, targets, labels))
    ref = jax.block_until_ready(_reference(logits, targets.astype(jnp.int32), labels))

    assert jnp.allclose(loss, ref, rtol=1e-4, atol=1e-5), (loss, ref)
    print("KERNEL_OK")
</pallas_src>

<mosaic_0001>
module attributes {stable_mosaic.version = 11 : i64} {
  func.func @_dice_kernel(%arg0: i32, %arg1: i32, %arg2: i32, %arg3: memref<8x512xf32, #tpu.memory_space<vmem>>, %arg4: memref<8x512xi8, #tpu.memory_space<vmem>>, %arg5: memref<8x3xf32, #tpu.memory_space<vmem>>, %arg6: memref<8x3xf32, #tpu.memory_space<vmem>>, %arg7: memref<8x3xf32, #tpu.memory_space<vmem>>) attributes {dimension_semantics = [#tpu.dimension_semantics<parallel>, #tpu.dimension_semantics<arbitrary>, #tpu.dimension_semantics<arbitrary>], iteration_bounds = array<i64: 1, 1, 3>, scalar_prefetch = 0 : i64, scratch_operands = 2 : i64, tpu.core_type = #tpu.core_type<tc>, window_params = [{transform_indices = @transform_0, window_bounds = array<i64: 8, 512>}, {transform_indices = @transform_1, window_bounds = array<i64: 8, 512>}, {transform_indices = @transform_2, window_bounds = array<i64: 8, 3>}]} {
    %c0_i32 = arith.constant 0 : i32
    %0 = arith.cmpi eq, %arg1, %c0_i32 : i32
    %c0_i32_0 = arith.constant 0 : i32
    %1 = arith.cmpi eq, %arg2, %c0_i32_0 : i32
    %2 = arith.andi %0, %1 : i1
    %3 = arith.extui %2 : i1 to i32
    %c0_i32_1 = arith.constant 0 : i32
    %4 = arith.cmpi ne, %3, %c0_i32_1 : i32
    scf.if %4 {
      %cst_20 = arith.constant 0.000000e+00 : f32
      %43 = vector.broadcast %cst_20 : f32 to vector<8x3xf32>
      %c0_21 = arith.constant 0 : index
      %c0_22 = arith.constant 0 : index
      %44 = vector.load %arg6[%c0_21, %c0_22] : memref<8x3xf32, #tpu.memory_space<vmem>>, vector<8x3xf32>
      tpu.vector_store %arg6[%c0_21, %c0_22], %43 {strides = array<i32>} : memref<8x3xf32, #tpu.memory_space<vmem>>, vector<8x3xf32>,
      %cst_23 = arith.constant 0.000000e+00 : f32
      %45 = vector.broadcast %cst_23 : f32 to vector<8x3xf32>
      %c0_24 = arith.constant 0 : index
      %c0_25 = arith.constant 0 : index
      %46 = vector.load %arg7[%c0_24, %c0_25] : memref<8x3xf32, #tpu.memory_space<vmem>>, vector<8x3xf32>
      tpu.vector_store %arg7[%c0_24, %c0_25], %45 {strides = array<i32>} : memref<8x3xf32, #tpu.memory_space<vmem>>, vector<8x3xf32>,
    } else {
    }
    %c0 = arith.constant 0 : index
    %c0_2 = arith.constant 0 : index
    %5 = vector.load %arg3[%c0, %c0_2] : memref<8x512xf32, #tpu.memory_space<vmem>>, vector<8x512xf32>
    %c0_3 = arith.constant 0 : index
    %c0_4 = arith.constant 0 : index
    %6 = vector.load %arg4[%c0_3, %c0_4] : memref<8x512xi8, #tpu.memory_space<vmem>>, vector<8x512xi8>
    %7 = arith.extsi %6 : vector<8x512xi8> to vector<8x512xi32>
    %8 = vector.broadcast %arg2 : i32 to vector<8x512xi32>
    %9 = arith.cmpi eq, %7, %8 : vector<8x512xi32>
    %cst = arith.constant 0.000000e+00 : f32
    %10 = vector.broadcast %cst : f32 to vector<8x512xf32>
    %11 = arith.select %9, %5, %10 : vector<8x512xi1>, vector<8x512xf32>
    %cst_5 = arith.constant dense<0.000000e+00> : vector<8xf32>
    %12 = vector.multi_reduction <add>, %11, %cst_5 [1] : vector<8x512xf32> to vector<8xf32>
    %13 = vector.shape_cast %12 : vector<8xf32> to vector<8x1xf32>
    %cst_6 = arith.constant dense<0.000000e+00> : vector<8xf32>
    %14 = vector.multi_reduction <add>, %5, %cst_6 [1] : vector<8x512xf32> to vector<8xf32>
    %15 = vector.shape_cast %14 : vector<8xf32> to vector<8x1xf32>
    %16 = arith.extui %9 : vector<8x512xi1> to vector<8x512xi32>
    %17 = arith.sitofp %16 : vector<8x512xi32> to vector<8x512xf32>
    %cst_7 = arith.constant dense<0.000000e+00> : vector<8xf32>
    %18 = vector.multi_reduction <add>, %17, %cst_7 [1] : vector<8x512xf32> to vector<8xf32>
    %19 = vector.shape_cast %18 : vector<8xf32> to vector<8x1xf32>
    %20 = arith.addf %15, %19 : vector<8x1xf32>
    %21 = tpu.iota {dimensions = array<i32: 1>} : vector<8x3xi32>
    %22 = vector.broadcast %arg2 : i32 to vector<8x3xi32>
    %23 = arith.cmpi eq, %21, %22 : vector<8x3xi32>
    %c0_8 = arith.constant 0 : index
    %c0_9 = arith.constant 0 : index
    %24 = vector.load %arg6[%c0_8, %c0_9] : memref<8x3xf32, #tpu.memory_space<vmem>>, vector<8x3xf32>
    %cst_10 = arith.constant 0.000000e+00 : f32
    %25 = vector.shape_cast %13 : vector<8x1xf32> to vector<8x1xf32>
    %26 = vector.broadcast %25 : vector<8x1xf32> to vector<8x3xf32>
    %27 = vector.broadcast %cst_10 : f32 to vector<8x3xf32>
    %28 = arith.select %23, %26, %27 : vector<8x3xi1>, vector<8x3xf32>
    %29 = arith.addf %24, %28 : vector<8x3xf32>
    %c0_11 = arith.constant 0 : index
    %c0_12 = arith.constant 0 : index
    %30 = vector.load %arg6[%c0_11, %c0_12] : memref<8x3xf32, #tpu.memory_space<vmem>>, vector<8x3xf32>
    tpu.vector_store %arg6[%c0_11, %c0_12], %29 {strides = array<i32>} : memref<8x3xf32, #tpu.memory_space<vmem>>, vector<8x3xf32>,
    %c0_13 = arith.constant 0 : index
    %c0_14 = arith.constant 0 : index
    %31 = vector.load %arg7[%c0_13, %c0_14] : memref<8x3xf32, #tpu.memory_space<vmem>>, vector<8x3xf32>
    %cst_15 = arith.constant 0.000000e+00 : f32
    %32 = vector.shape_cast %20 : vector<8x1xf32> to vector<8x1xf32>
    %33 = vector.broadcast %32 : vector<8x1xf32> to vector<8x3xf32>
    %34 = vector.broadcast %cst_15 : f32 to vector<8x3xf32>
    %35 = arith.select %23, %33, %34 : vector<8x3xi1>, vector<8x3xf32>
    %36 = arith.addf %31, %35 : vector<8x3xf32>
    %c0_16 = arith.constant 0 : index
    %c0_17 = arith.constant 0 : index
    %37 = vector.load %arg7[%c0_16, %c0_17] : memref<8x3xf32, #tpu.memory_space<vmem>>, vector<8x3xf32>
    tpu.vector_store %arg7[%c0_16, %c0_17], %36 {strides = array<i32>} : memref<8x3xf32, #tpu.memory_space<vmem>>, vector<8x3xf32>,
    %c0_i32_18 = arith.constant 0 : i32
    %38 = arith.cmpi eq, %arg1, %c0_i32_18 : i32
    %c2_i32 = arith.constant 2 : i32
    %39 = arith.cmpi eq, %arg2, %c2_i32 : i32
    %40 = arith.andi %38, %39 : i1
    %41 = arith.extui %40 : i1 to i32
    %c0_i32_19 = arith.constant 0 : i32
    %42 = arith.cmpi ne, %41, %c0_i32_19 : i32
    scf.if %42 {
      %c0_20 = arith.constant 0 : index
      %c0_21 = arith.constant 0 : index
      %43 = vector.load %arg6[%c0_20, %c0_21] : memref<8x3xf32, #tpu.memory_space<vmem>>, vector<8x3xf32>
      %cst_22 = arith.constant 2.000000e+00 : f32
      %44 = vector.broadcast %cst_22 : f32 to vector<8x3xf32>
      %45 = arith.mulf %44, %43 : vector<8x3xf32>
      %c0_23 = arith.constant 0 : index
      %c0_24 = arith.constant 0 : index
      %46 = vector.load %arg7[%c0_23, %c0_24] : memref<8x3xf32, #tpu.memory_space<vmem>>, vector<8x3xf32>
      %cst_25 = arith.constant 9.99999974E-6 : f32
      %47 = vector.broadcast %cst_25 : f32 to vector<8x3xf32>
      %48 = arith.addf %46, %47 : vector<8x3xf32>
      %49 = arith.divf %45, %48 : vector<8x3xf32>
      %cst_26 = arith.constant 1.000000e+00 : f32
      %50 = vector.broadcast %cst_26 : f32 to vector<8x3xf32>
      %51 = arith.subf %50, %49 : vector<8x3xf32>
      %c0_27 = arith.constant 0 : index
      %c0_28 = arith.constant 0 : index
      %52 = vector.load %arg5[%c0_27, %c0_28] : memref<8x3xf32, #tpu.memory_space<vmem>>, vector<8x3xf32>
      tpu.vector_store %arg5[%c0_27, %c0_28], %51 {strides = array<i32>} : memref<8x3xf32, #tpu.memory_space<vmem>>, vector<8x3xf32>,
    } else {
    }
    return
  }
  func.func @transform_0(%arg0: i32, %arg1: i32, %arg2: i32) -> (i32, i32) {
    %c1_i32 = arith.constant 1 : i32
    %0 = arith.muli %arg2, %c1_i32 : i32
    %1 = arith.addi %0, %arg1 : i32
    %c0_i32 = arith.constant 0 : i32
    return %arg0, %1 : i32, i32
  }
  func.func @transform_1(%arg0: i32, %arg1: i32, %arg2: i32) -> (i32, i32) {
    %c0_i32 = arith.constant 0 : i32
    return %arg0, %arg1 : i32, i32
  }
  func.func @transform_2(%arg0: i32, %arg1: i32, %arg2: i32) -> (i32, i32) {
    %c0_i32 = arith.constant 0 : i32
    %c0_i32_0 = arith.constant 0 : i32
    return %arg0, %c0_i32 : i32, i32
  }
}

</mosaic_0001>

<bundles_post_ra>
// kernel: tpu_custom_call.1
= control target key start
LH: loop header
LB: loop body
LE: loop exit
PB: predicated region body
PF: predicated region fallthrough
CT: control target
= control target key end

     0   :  { %7 = vsyncpa [#allocation5], 0  ;;  %s758_s0 = inlined_call_operand.hbm [shape: f32[8,1536], index: 0, kind: input, shape index: {}]   ;;  %s759_s1 = inlined_call_operand.hbm [shape: s8[8,512], index: 1, kind: input, shape index: {}]   ;;  %s760_s2 = inlined_call_operand.vmem [shape: f32[8,3], index: 2, kind: output, shape index: {}]  }
   0x1   :  { %9 = vsyncpa [#allocation5 + $0x1], 0 }
   0x2   :  { %10 = vsyncpa [#allocation7], 0  ;;  %s625_s9 = smov 0   ;;  %s627_s10 = smov 0  }
   0x3   :  { %s629_s11 = smov 0   ;;  %s631_s12 = smov 0  }
   0x4   :  { %s633_s13 = smov 0   ;;  %s635_s14 = smov 0  }
   0x5 LB: > { %s399_s15 = sadd.s32 4294967295, %s605_s14   ;;  %p59_p0 = scmp.ne.s32.totalorder %s589_s10, %s585_s9  ;;  %s605_s14 = sphi %s635_s14, %s16_s14   ;;  %s601_s13 = sphi %s633_s13, %s773_s13   ;;  %s597_s12 = sphi %s631_s12, %s772_s12   ;;  %s593_s11 = sphi %s629_s11, %s771_s11   ;;  %s589_s10 = sphi %s627_s10, %s770_s10   ;;  %s585_s9 = sphi %s625_s9, %s769_s9  }
   0x6   : > { %p655_p1 = scmp.eq.s32.totalorder %s399_s15, 0  ;;  %p400_p2 = scmp.ge.s32.totalorder %s605_s14, 1 }
   0x7   : > { %p124_p3 = scmp.lt.s32.totalorder %s605_s14, 4  ;;  %s141_s20 = sshll.u32 %s759_s1, 4  ;;  %s142_s20 = int_to_ptr.hbm [resolvable:$true] %s141_s20 }
   0x8   : > { %p663_p4 = por %p655_p1, %p59_p0  ;;  %s607_s22 = smov [#allocation6]  }
   0x9   : > { %p670_p5 = pnand %p400_p2, %p124_p3  ;;  %s143_s23 = sshll.u32 %s607_s22, 4  ;;  %s144_s23 = int_to_ptr.vmem [resolvable:$true] %s143_s23 }
   0xa   : > { %s28_s24 = sadd.s32 1, %s601_s13  ;;  %p53_p9 = scmp.ne.s32.totalorder %s593_s11, %s589_s10 }
   0xb   : > { %p427_p6 = pneg %p670_p5  ;;  %p29_p8 = scmp.ge.s32.totalorder %s28_s24, 3 }
   0xc   : > { %p54_p10 = scmp.eq.s32.totalorder %s605_s14, 0  ;;  %s46_s25 = sadd.s32 1, %s593_s11 }
   0xd   : > { %p428_p7 = pnand %p427_p6, %p655_p1  ;;  %s775_s24 = smov (%p29_p8, %s28_s24), 0 }
   0xe   : > { %p685_p11 = por %p54_p10, %p53_p9  ;;  %s42_s27 = ssub.s32 %s601_s13, %s775_s24 }
   0xf   : > { %430 = dma.hbm_to_vmem [thread:$0]  (!%p428_p7), %s142_s20, 128, %s144_s23, [#allocation7]  }
  0x10   : > { %s154_s28 = sand.u32 1, %s593_s11   ;;  %p44_p12 = scmp.eq.s32.totalorder %s42_s27, 0 }
  0x11   : > { %p436_p13 = scmp.lt.s32.totalorder %s605_s14, 3  ;;  %s403_s29 = sshll.u32 %s154_s28, 5 }
  0x12   : > { %s418_s30 = sshll.u32 %s601_s13, 5  ;;  %s158_s8 = scalar_lea.vmem [#allocation4], %s403_s29 }
  0x13   : > { %s695_s3 = scalar_select %p44_p12, %s593_s11, %s46_s25  }
  0x14   : > { %s166_s6 = scalar_lea.hbm %s758_s0, %s418_s30  ;;  %s170_s9 = sshll.u32 %s158_s8, 4  ;;  %s171_s9 = int_to_ptr.vmem [resolvable:$true] %s170_s9 }
  0x15   : > { %s168_s7 = sshll.u32 %s166_s6, 4  ;;  %p432_p0 = pnand %p436_p13, %p685_p11  ;;  %s169_s7 = int_to_ptr.hbm [resolvable:$true] %s168_s7 }
  0x16   : > { %s155_s15 = scalar_lea.sflag [#allocation5], %s154_s28  ;;  %179 = sbr.rel (%p670_p5) target bundleno = 205 (0xcd), region = 28 }
  0x17   : > { %434 = dma.hbm_to_vmem [thread:$0]  (!%p432_p0), %s169_s7, 512, %s171_s9, %s155_s15  }
  0x18   : > { %s181_s18 = sand.u32 (!%p670_p5), 1, %s589_s10  }
  0x19   : > { %s407_s19 = sshll.u32 (!%p670_p5), %s181_s18, 5  ;;  %s182_s20 = scalar_lea.sflag (!%p670_p5), [#allocation5], %s181_s18 }
  0x1a   : > { %s185_s22 = scalar_lea.vmem (!%p670_p5), [#allocation4], %s407_s19 }
  0x1b   : > { %576 = dma.done.wait (%p663_p4), %s182_s20, 512  }
  0x1c   : > { %578 = vsyncadd (%p663_p4), %s182_s20, 4294966784 }
  0x1d   : > { %580 = dma.done.wait (%p655_p1), [#allocation7], 128  }
  0x1e   : > { %582 = vsyncadd (%p655_p1), [#allocation7], 4294967168  ;;  %p219_p2 = scmp.eq.s32.totalorder %s597_s12, 0 }
  0x1f   : > { %vm224_vm0 = vcmask (%p219_p2), 23552   ;;  %v608_v0 = vmov (%p219_p2), 0.0  }
  0x20   : > { %223 = sbr.rel (!%p219_p2) target bundleno = 37 (0x25), region = 40  ;;  %225 = vst.msk [vmem:[#allocation2] sm:$0xff] (%p219_p2), %vm224_vm0, %v608_v0 }
  0x21   : > { %226 = vst.msk [vmem:[#allocation3] sm:$0xff] (%p219_p2), %vm224_vm0, %v608_v0 }
  0x25 PF: > { %v227_v1 = vld [vmem:[%s185_s22] sm:$0xff]  ;;  %v228_v2 = vld [vmem:[%s185_s22 + $0x8] sm:$0xff]  ;;  %v229_v3 = vld [vmem:[%s185_s22 + $0x10] sm:$0xff]  ;;  %v236_v6 = vstv %s597_s12  ;;  %v609_v16 = vmov 0.0   ;;  %p281_p1 = scmp.eq.s32.totalorder %s597_s12, 2  ;;  %v269_v31 = vlaneseq  ;;  %vm275_vm6 = vcmask 23552  }
  0x26   : > { %v250_v4 = vadd.f32 %v228_v2, %v227_v1  ;;  %v231_v5 = vld [vmem:[#allocation6] sm:$0xff]  ;;  %v230_v7 = vld [vmem:[%s185_s22 + $0x18] sm:$0xff] }
  0x27   : > { %v232_v8 = vunpack.c.0.s8 %v231_v5  ;;  %v233_v9 = vunpack.c.1.s8 %v231_v5  ;;  %v234_v10 = vunpack.c.2.s8 %v231_v5  ;;  %v235_v11 = vunpack.c.3.s8 %v231_v5  ;;  %v272_v34 = vld [vmem:[#allocation2] sm:$0xff] }
  0x28   : > { %v251_v12 = vadd.f32 %v250_v4, %v229_v3  ;;  %v270_v33 = vand.u32 127, %v269_v31  ;;  %v277_v40 = vld [vmem:[#allocation3] sm:$0xff] }
  0x29   : > { %vm237_vm1 = vcmp.eq.s32.totalorder %v232_v8, %v236_v6  ;;  %vm238_vm2 = vcmp.eq.s32.totalorder %v233_v9, %v236_v6  ;;  %vm715_vm3 = vcmp.eq.s32.totalorder %v234_v10, %v236_v6  ;;  %vm719_vm4 = vcmp.eq.s32.totalorder %v235_v11, %v236_v6 }
  0x2a   : > { %v252_v15 = vadd.f32 %v251_v12, %v230_v7  ;;  %v410_v17 = vsel %vm237_vm1, 1.0, %v609_v16  ;;  %v411_v18 = vsel %vm238_vm2, 1.0, %v609_v16  ;;  %v412_v19 = vsel %vm715_vm3, 1.0, %v609_v16 }
  0x2b   : > { %v263_v20 = vadd.f32 %v411_v18, %v410_v17  ;;  %v241_v21 = vsel %vm237_vm1, %v227_v1, 0.0  ;;  %v242_v22 = vsel %vm238_vm2, %v228_v2, 0.0  ;;  %v243_v23 = vsel %vm715_vm3, %v229_v3, 0.0 }
  0x2c   : > { %253 = vadd.xlane.f32.xlu0 %v252_v15  ;;  %v245_v24 = vadd.f32 %v242_v22, %v241_v21  ;;  %v413_v25 = vsel %vm719_vm4, 1.0, %v609_v16  ;;  %v244_v27 = vsel %vm719_vm4, %v230_v7, 0.0  ;;  %vm271_vm5 = vcmp.eq.s32.totalorder %v270_v33, %v236_v6 }
  0x2d   : > { %v264_v26 = vadd.f32 %v412_v19, %v263_v20 }
  0x2e   : > { %v246_v28 = vadd.f32 %v245_v24, %v243_v23 }
  0x2f   : > { %v265_v29 = vadd.f32 %v413_v25, %v264_v26 }
  0x30   : > { %v247_v30 = vadd.f32 %v246_v28, %v244_v27 }
  0x32   : > { %248 = vadd.xlane.f32.xlu1 %v247_v30 }
  0x34   : > { %266 = vadd.xlane.f32.xlu0 %v265_v29 }
  0x9f   : > { %v254_v32 = vpop.xlane.xlu0 %253 }
  0xa5   : > { %v249_v35 = vpop.xlane.xlu1 %248 }
  0xa6   : > { %v273_v36 = vsel %vm271_vm5, %v249_v35, 0.0 }
  0xa7   : > { %v267_v37 = vpop.xlane.xlu0 %266  ;;  %v274_v38 = vadd.f32 %v273_v36, %v272_v34 }
  0xa8   : > { %v268_v39 = vadd.f32 %v267_v37, %v254_v32 }
  0xa9   : > { %276 = vst.msk [vmem:[#allocation2] sm:$0xff] %vm275_vm6, %v274_v38  ;;  %285 = sbr.rel (!%p281_p1) target bundleno = 205 (0xcd), region = 44 }
  0xaa   : > { %v278_v41 = vsel %vm271_vm5, %v268_v39, 0.0 }
  0xab   : > { %v279_v42 = vadd.f32 %v278_v41, %v277_v40 }
  0xad   : > { %280 = vst.msk [vmem:[#allocation3] sm:$0xff] %vm275_vm6, %v279_v42 }
  0xb0   : > { %v286_v50 = vld [vmem:[#allocation2] sm:$0xff] }
  0xb1   : > { %v287_v53 = vmul.f32 2.0, %v286_v50 }
  0xb4   : > { %v288_v43 = vld [vmem:[#allocation3] sm:$0xff] }
  0xb5   : > { %v289_v44 = vadd.f32 1e-05, %v288_v43 }
  0xb7   : > { %489 = vrcp.f32 %v289_v44  ;;  %v301_v47 = vand.u32 2147483648, %v289_v44  ;;  %vm295_vm7 = vweird.f32 %v289_v44  ;;  %v299_v49 = vand.u32 2147483647, %v289_v44 }
  0xb9   : > { %v302_v52 = vor.u32 1.1754944e-38, %v301_v47  ;;  %vm300_vm10 = vcmp.eq.f32.partialorder %v299_v49, 8.507059e+37 }
  0xbd   : > { %v490_v45 = vpop.eup %489 }
  0xbe   : > { %v291_v46 = vmul.f32 %v490_v45, %v289_v44  ;;  %vm296_vm8 = vweird.f32 %v490_v45 }
  0xbf   : > { %vm297_vm9 = vmor %vm295_vm7, %vm296_vm8 }
  0xc0   : > { %v292_v48 = vsub.f32 1.0, %v291_v46 }
  0xc2   : > { %v293_v51 = vmul.f32 %v490_v45, %v292_v48 }
  0xc4   : > { %v294_v54 = vadd.f32 %v490_v45, %v293_v51 }
  0xc6   : > { %v298_v55 = vsel %vm297_vm9, %v490_v45, %v294_v54 }
  0xc7   : > { %v303_v56 = vsel %vm300_vm10, %v302_v52, %v298_v55 }
  0xc8   : > { %v304_v57 = vmul.f32 %v303_v56, %v287_v53 }
  0xca   : > { %v305_v58 = vsub.f32 1.0, %v304_v57 }
  0xcc   : > { %306 = vst.msk [vmem:[%s760_s2] sm:$0xff] %vm275_vm6, %v305_v58 }
  0xcd PF: > { %s16_s14 = sadd.s32 1, %s605_s14   ;;  %s769_s9 = smov %s589_s10 }
  0xce   : > { %p13_p3 = scmp.ge.s32.totalorder %s16_s14, 5   ;;  %s770_s10 = smov %s593_s11 }
  0xcf   : > { %s771_s11 = smov %s695_s3  ;;  %s772_s12 = smov %s601_s13 }
  0xd0   : > { %s773_s13 = smov %s775_s24  ;;  %15 = sbr.rel (!%p13_p3) target bundleno = 5 (0x5), region = 81 }
  0xd5   :  { %326 = vsyncpa [#allocation5], 1 }
  0xd6   :  { %328 = vsyncpa [#allocation5 + $0x1], 1 }
  0xd7   :  { %329 = vsyncpa [#allocation7], 1 }

</bundles_post_ra>
